<compile_context>
chip_gen: v6e
topology: v6e:2x2x1
jax: 0.10.0
libtpu: 0.0.40
codegen_flags: <defaults>
</compile_context>

<pallas_src>
import jax
import jax.numpy as jnp
from jax import lax
from jax.experimental import pallas as pl
from jax.experimental.pallas import tpu as pltpu

SP_PAD = 128  # conv spatial (OH*OW = 49) padded to one full lane tile


# ----------------------------------------------------------------------------
# Fused Pallas kernel: conv matmul -> encoder FC -> head -> fc -> tanh
# Everything batched over B; all operands whole in VMEM; no Python loops.
# ----------------------------------------------------------------------------
def _fused_actor_kernel(p_ref, cw_ref, cb_ref, ew_ref, eb_ref,
                        whl_ref, whp_ref, wha_ref, hb_ref,
                        wf_ref, fb_ref, pos_ref, act_ref, o_ref):
    B = p_ref.shape[0]
    out_ch, ckk = cw_ref.shape
    sp_pad = p_ref.shape[-1]

    patches = p_ref[...]                                   # (B, C*k*k, SP_PAD)

    # Conv as ONE batched matmul over B: (B,8,36) @ (B,36,128) -> (B,8,128).
    cw_b = jnp.broadcast_to(cw_ref[...][None], (B, out_ch, ckk))
    conv = lax.dot_general(
        cw_b, patches,
        dimension_numbers=(((2,), (1,)), ((0,), (0,))),
        preferred_element_type=jnp.float32)                # (B, out_ch, SP_PAD)
    conv = jnp.maximum(conv + cb_ref[...], 0.0)            # bias (1, out_ch, 1)

    # NCHW flatten: lane dim is exactly 128, so this collapse is a free
    # re-tiling, giving column order (oc, spatial) — enc_w_pad matches it.
    flat = conv.reshape(B, out_ch * sp_pad)                # (B, 1024)

    # Encoder FC as ONE dot (padded enc_w rows are zero, so padded lanes of
    # `flat` — relu(conv_bias) garbage — contribute nothing).
    latent = jnp.maximum(
        jnp.dot(flat, ew_ref[...], preferred_element_type=jnp.float32)
        + eb_ref[...], 0.0)                                # (B, latent)

    # Head Linear + ReLU; state = [latent, relative_pos, last_act] realised
    # implicitly by summing dots against head_w row blocks (no concat).
    h = jnp.dot(latent, whl_ref[...], preferred_element_type=jnp.float32)
    h = h + jnp.dot(pos_ref[...], whp_ref[...], preferred_element_type=jnp.float32)
    h = h + jnp.dot(act_ref[...], wha_ref[...], preferred_element_type=jnp.float32)
    h = jnp.maximum(h + hb_ref[...], 0.0)                  # (B, feat)

    # fc Linear + tanh, single whole-block store.
    a = jnp.dot(h, wf_ref[...], preferred_element_type=jnp.float32) + fb_ref[...]
    o_ref[...] = jnp.tanh(a).astype(o_ref.dtype)


# ----------------------------------------------------------------------------
# Plain-JAX glue (jit-fused): im2col via 9 static strided slices (no gathers).
# Rows ordered c*k*k + kh*k + kw to match conv_w.reshape(out_ch, C*k*k).
# ----------------------------------------------------------------------------
def _conv_patches(obs, k, stride, pad_to):
    B, C, H, W = obs.shape
    OH = (H - k) // stride + 1
    OW = (W - k) // stride + 1
    cols = []
    for kh in range(k):
        for kw in range(k):
            sl = obs[:, :, kh:kh + stride * (OH - 1) + 1:stride,
                           kw:kw + stride * (OW - 1) + 1:stride]   # (B,C,OH,OW)
            cols.append(sl.reshape(B, C, OH * OW))
    x = jnp.stack(cols, axis=2).reshape(B, C * k * k, OH * OW)     # (B,Ck^2,49)
    return jnp.pad(x, ((0, 0), (0, 0), (0, pad_to - OH * OW)))     # (B,Ck^2,128)


# ----------------------------------------------------------------------------
# One-time parameter re-layout: fold the NCHW-flatten permutation + spatial
# padding into enc_w, split head_w into its three row blocks.
# ----------------------------------------------------------------------------
def prepare_params(params, *, sp_pad=SP_PAD):
    f32 = jnp.float32
    out_ch, in_ch, k, _ = params["conv_w"].shape
    latent_dim = params["enc_w"].shape[1]
    spatial = params["enc_w"].shape[0] // out_ch           # OH*OW
    assert spatial <= sp_pad
    ew3 = params["enc_w"].reshape(out_ch, spatial, latent_dim).astype(f32)
    ew_pad = jnp.zeros((out_ch, sp_pad, latent_dim), f32).at[:, :spatial, :].set(ew3)
    return {
        "conv_w2": params["conv_w"].reshape(out_ch, in_ch * k * k).astype(f32),
        "conv_b": params["conv_b"].reshape(1, out_ch, 1).astype(f32),
        "enc_w_pad": ew_pad.reshape(out_ch * sp_pad, latent_dim),
        "enc_b": params["enc_b"].reshape(1, -1).astype(f32),
        "head_w_lat": params["head_w"][:latent_dim].astype(f32),
        "head_w_pos": params["head_w"][latent_dim:latent_dim + 2].astype(f32),
        "head_w_act": params["head_w"][latent_dim + 2:latent_dim + 4].astype(f32),
        "head_b": params["head_b"].reshape(1, -1).astype(f32),
        "fc_w": params["fc_w"].astype(f32),
        "fc_b": params["fc_b"].reshape(1, -1).astype(f32),
    }


# ----------------------------------------------------------------------------
# Actor forward (jitted): strided-slice im2col + ONE fused pallas_call
# ----------------------------------------------------------------------------
@jax.jit
def actor_forward(prepped, obs, last_act, relative_pos):
    B = obs.shape[0]
    k, stride = 3, 2

    patches = _conv_patches(obs.astype(jnp.float32), k, stride, SP_PAD)
    pos = jnp.asarray(relative_pos, jnp.float32).reshape(-1, 2)
    act = jnp.asarray(last_act, jnp.float32).reshape(-1, 2)

    args = (patches, prepped["conv_w2"], prepped["conv_b"], prepped["enc_w_pad"],
            prepped["enc_b"], prepped["head_w_lat"], prepped["head_w_pos"],
            prepped["head_w_act"], prepped["head_b"], prepped["fc_w"],
            prepped["fc_b"], pos, act)

    out_ch, ckk = prepped["conv_w2"].shape
    latent_dim = prepped["enc_b"].shape[-1]
    feat = prepped["head_b"].shape[-1]
    adim = prepped["fc_b"].shape[-1]

    flops = 2 * B * (out_ch * ckk * SP_PAD            # conv matmul
                     + out_ch * SP_PAD * latent_dim   # encoder FC
                     + (latent_dim + 4) * feat        # head FC
                     + feat * adim)                   # fc
    bytes_accessed = sum(int(a.size) * 4 for a in args) + B * adim * 4

    vmem_spec = pl.BlockSpec(memory_space=pltpu.MemorySpace.VMEM)
    return pl.pallas_call(
        _fused_actor_kernel,
        out_shape=jax.ShapeDtypeStruct((B, adim), jnp.float32),
        in_specs=[vmem_spec] * len(args),
        out_specs=vmem_spec,
        cost_estimate=pl.CostEstimate(flops=flops,
                                      transcendentals=B * adim,
                                      bytes_accessed=bytes_accessed),
    )(*args)


# ----------------------------------------------------------------------------
# Pure-JAX reference (correctness check) and deterministic params
# ----------------------------------------------------------------------------
def reference_forward(params, obs, last_act, relative_pos):
    B = obs.shape[0]
    conv = lax.conv_general_dilated(
        obs, params["conv_w"], window_strides=(2, 2), padding="VALID",
        dimension_numbers=("NCHW", "OIHW", "NCHW"))
    conv = jax.nn.relu(conv + params["conv_b"][None, :, None, None])
    flat = conv.reshape(B, -1)                               # NCHW flatten
    latent = jax.nn.relu(flat @ params["enc_w"] + params["enc_b"])
    state = jnp.concatenate(
        [latent,
         jnp.asarray(relative_pos, jnp.float32).reshape(-1, 2),
         jnp.asarray(last_act, jnp.float32).reshape(-1, 2)], axis=1)
    h = jax.nn.relu(state @ params["head_w"] + params["head_b"])
    return jnp.tanh(h @ params["fc_w"] + params["fc_b"])


def init_params(key, *, in_ch=4, out_ch=8, k=3, conv_spatial=7,
                latent_dim=32, feature_dim=32, action_dim=2):
    keys = jax.random.split(key, 8)
    flat_conv = out_ch * conv_spatial * conv_spatial
    state_dim = latent_dim + 2 + 2
    s = 0.1
    return {
        "conv_w": s * jax.random.normal(keys[0], (out_ch, in_ch, k, k), jnp.float32),
        "conv_b": s * jax.random.normal(keys[1], (out_ch,), jnp.float32),
        "enc_w":  s * jax.random.normal(keys[2], (flat_conv, latent_dim), jnp.float32),
        "enc_b":  s * jax.random.normal(keys[3], (latent_dim,), jnp.float32),
        "head_w": s * jax.random.normal(keys[4], (state_dim, feature_dim), jnp.float32),
        "head_b": s * jax.random.normal(keys[5], (feature_dim,), jnp.float32),
        "fc_w":   s * jax.random.normal(keys[6], (feature_dim, action_dim), jnp.float32),
        "fc_b":   s * jax.random.normal(keys[7], (action_dim,), jnp.float32),
    }


if __name__ == "__main__":
    key = jax.random.PRNGKey(0)
    k_obs, k_act, k_pos, k_par = jax.random.split(key, 4)

    B, C, H, W = 2, 4, 16, 16
    obs = jax.random.normal(k_obs, (B, C, H, W), jnp.float32)        # NCHW
    last_act = jax.random.normal(k_act, (B, 2), jnp.float32)
    relative_pos = jax.random.normal(k_pos, (B, 2), jnp.float32)

    params = init_params(k_par, in_ch=C)
    prepped = prepare_params(params)                                 # one-time re-layout

    out = actor_forward(prepped, obs, last_act, relative_pos)
    out = jax.block_until_ready(out)

    ref = jax.block_until_ready(reference_forward(params, obs, last_act, relative_pos))

    assert out.shape == (B, 2) and out.dtype == jnp.float32
    assert bool(jnp.all(jnp.abs(out) <= 1.0))                        # tanh range
    assert bool(jnp.allclose(out, ref, atol=1e-4, rtol=1e-4)), (out, ref)
    print("KERNEL_OK")
</pallas_src>

<mosaic_0001>
module attributes {stable_mosaic.version = 11 : i64} {
  func.func @_fused_actor_kernel(%arg0: memref<2x36x128xf32, #tpu.memory_space<vmem>>, %arg1: memref<8x36xf32, #tpu.memory_space<vmem>>, %arg2: memref<1x8x1xf32, #tpu.memory_space<vmem>>, %arg3: memref<1024x32xf32, #tpu.memory_space<vmem>>, %arg4: memref<1x32xf32, #tpu.memory_space<vmem>>, %arg5: memref<32x32xf32, #tpu.memory_space<vmem>>, %arg6: memref<2x32xf32, #tpu.memory_space<vmem>>, %arg7: memref<2x32xf32, #tpu.memory_space<vmem>>, %arg8: memref<1x32xf32, #tpu.memory_space<vmem>>, %arg9: memref<32x2xf32, #tpu.memory_space<vmem>>, %arg10: memref<1x2xf32, #tpu.memory_space<vmem>>, %arg11: memref<2x2xf32, #tpu.memory_space<vmem>>, %arg12: memref<2x2xf32, #tpu.memory_space<vmem>>, %arg13: memref<2x2xf32, #tpu.memory_space<vmem>>) attributes {dimension_semantics = [], scalar_prefetch = 0 : i64, scratch_operands = 0 : i64, tpu.core_type = #tpu.core_type<tc>} {
    %c0 = arith.constant 0 : index
    %c0_0 = arith.constant 0 : index
    %c0_1 = arith.constant 0 : index
    %0 = vector.load %arg0[%c0, %c0_0, %c0_1] : memref<2x36x128xf32, #tpu.memory_space<vmem>>, vector<2x36x128xf32>
    %c0_2 = arith.constant 0 : index
    %c0_3 = arith.constant 0 : index
    %1 = vector.load %arg1[%c0_2, %c0_3] : memref<8x36xf32, #tpu.memory_space<vmem>>, vector<8x36xf32>
    %2 = vector.shape_cast %1 : vector<8x36xf32> to vector<1x8x36xf32>
    %3 = vector.shape_cast %2 : vector<1x8x36xf32> to vector<1x8x36xf32>
    %4 = vector.broadcast %3 : vector<1x8x36xf32> to vector<2x8x36xf32>
    %cst = arith.constant dense<0.000000e+00> : vector<2x8x128xf32>
    %5 = tpu.matmul %4, %0, %cst {dimension_numbers = #tpu.dot_dimension_numbers<[2], [1], [1], [2], [0, 0, 0, 1, 1, 2], [0], [0]>} : vector<2x8x36xf32>, vector<2x36x128xf32>, vector<2x8x128xf32> -> vector<2x8x128xf32>
    %c0_4 = arith.constant 0 : index
    %c0_5 = arith.constant 0 : index
    %c0_6 = arith.constant 0 : index
    %6 = vector.load %arg2[%c0_4, %c0_5, %c0_6] : memref<1x8x1xf32, #tpu.memory_space<vmem>>, vector<1x8x1xf32>
    %7 = vector.broadcast %6 : vector<1x8x1xf32> to vector<2x8x128xf32>
    %8 = arith.addf %5, %7 : vector<2x8x128xf32>
    %cst_7 = arith.constant 0.000000e+00 : f32
    %9 = vector.broadcast %cst_7 : f32 to vector<2x8x128xf32>
    %10 = arith.maximumf %8, %9 : vector<2x8x128xf32>
    %11 = vector.shape_cast %10 : vector<2x8x128xf32> to vector<2x1024xf32>
    %c0_8 = arith.constant 0 : index
    %c0_9 = arith.constant 0 : index
    %12 = vector.load %arg3[%c0_8, %c0_9] : memref<1024x32xf32, #tpu.memory_space<vmem>>, vector<1024x32xf32>
    %cst_10 = arith.constant dense<0.000000e+00> : vector<2x32xf32>
    %13 = tpu.matmul %11, %12, %cst_10 {dimension_numbers = #tpu.dot_dimension_numbers<[1], [0], [0], [1], [0, 0, 1, 1], [], []>} : vector<2x1024xf32>, vector<1024x32xf32>, vector<2x32xf32> -> vector<2x32xf32>
    %c0_11 = arith.constant 0 : index
    %c0_12 = arith.constant 0 : index
    %14 = vector.load %arg4[%c0_11, %c0_12] : memref<1x32xf32, #tpu.memory_space<vmem>>, vector<1x32xf32>
    %15 = vector.broadcast %14 : vector<1x32xf32> to vector<2x32xf32>
    %16 = arith.addf %13, %15 : vector<2x32xf32>
    %cst_13 = arith.constant 0.000000e+00 : f32
    %17 = vector.broadcast %cst_13 : f32 to vector<2x32xf32>
    %18 = arith.maximumf %16, %17 : vector<2x32xf32>
    %c0_14 = arith.constant 0 : index
    %c0_15 = arith.constant 0 : index
    %19 = vector.load %arg5[%c0_14, %c0_15] : memref<32x32xf32, #tpu.memory_space<vmem>>, vector<32x32xf32>
    %cst_16 = arith.constant dense<0.000000e+00> : vector<2x32xf32>
    %20 = tpu.matmul %18, %19, %cst_16 {dimension_numbers = #tpu.dot_dimension_numbers<[1], [0], [0], [1], [0, 0, 1, 1], [], []>} : vector<2x32xf32>, vector<32x32xf32>, vector<2x32xf32> -> vector<2x32xf32>
    %c0_17 = arith.constant 0 : index
    %c0_18 = arith.constant 0 : index
    %21 = vector.load %arg11[%c0_17, %c0_18] : memref<2x2xf32, #tpu.memory_space<vmem>>, vector<2x2xf32>
    %c0_19 = arith.constant 0 : index
    %c0_20 = arith.constant 0 : index
    %22 = vector.load %arg6[%c0_19, %c0_20] : memref<2x32xf32, #tpu.memory_space<vmem>>, vector<2x32xf32>
    %cst_21 = arith.constant dense<0.000000e+00> : vector<2x32xf32>
    %23 = tpu.matmul %21, %22, %cst_21 {dimension_numbers = #tpu.dot_dimension_numbers<[1], [0], [0], [1], [0, 0, 1, 1], [], []>} : vector<2x2xf32>, vector<2x32xf32>, vector<2x32xf32> -> vector<2x32xf32>
    %24 = arith.addf %20, %23 : vector<2x32xf32>
    %c0_22 = arith.constant 0 : index
    %c0_23 = arith.constant 0 : index
    %25 = vector.load %arg12[%c0_22, %c0_23] : memref<2x2xf32, #tpu.memory_space<vmem>>, vector<2x2xf32>
    %c0_24 = arith.constant 0 : index
    %c0_25 = arith.constant 0 : index
    %26 = vector.load %arg7[%c0_24, %c0_25] : memref<2x32xf32, #tpu.memory_space<vmem>>, vector<2x32xf32>
    %cst_26 = arith.constant dense<0.000000e+00> : vector<2x32xf32>
    %27 = tpu.matmul %25, %26, %cst_26 {dimension_numbers = #tpu.dot_dimension_numbers<[1], [0], [0], [1], [0, 0, 1, 1], [], []>} : vector<2x2xf32>, vector<2x32xf32>, vector<2x32xf32> -> vector<2x32xf32>
    %28 = arith.addf %24, %27 : vector<2x32xf32>
    %c0_27 = arith.constant 0 : index
    %c0_28 = arith.constant 0 : index
    %29 = vector.load %arg8[%c0_27, %c0_28] : memref<1x32xf32, #tpu.memory_space<vmem>>, vector<1x32xf32>
    %30 = vector.broadcast %29 : vector<1x32xf32> to vector<2x32xf32>
    %31 = arith.addf %28, %30 : vector<2x32xf32>
    %cst_29 = arith.constant 0.000000e+00 : f32
    %32 = vector.broadcast %cst_29 : f32 to vector<2x32xf32>
    %33 = arith.maximumf %31, %32 : vector<2x32xf32>
    %c0_30 = arith.constant 0 : index
    %c0_31 = arith.constant 0 : index
    %34 = vector.load %arg9[%c0_30, %c0_31] : memref<32x2xf32, #tpu.memory_space<vmem>>, vector<32x2xf32>
    %cst_32 = arith.constant dense<0.000000e+00> : vector<2x2xf32>
    %35 = tpu.matmul %33, %34, %cst_32 {dimension_numbers = #tpu.dot_dimension_numbers<[1], [0], [0], [1], [0, 0, 1, 1], [], []>} : vector<2x32xf32>, vector<32x2xf32>, vector<2x2xf32> -> vector<2x2xf32>
    %c0_33 = arith.constant 0 : index
    %c0_34 = arith.constant 0 : index
    %36 = vector.load %arg10[%c0_33, %c0_34] : memref<1x2xf32, #tpu.memory_space<vmem>>, vector<1x2xf32>
    %37 = vector.broadcast %36 : vector<1x2xf32> to vector<2x2xf32>
    %38 = arith.addf %35, %37 : vector<2x2xf32>
    %39 = math.tanh %38 : vector<2x2xf32>
    %c0_35 = arith.constant 0 : index
    %c0_36 = arith.constant 0 : index
    %40 = vector.load %arg13[%c0_35, %c0_36] : memref<2x2xf32, #tpu.memory_space<vmem>>, vector<2x2xf32>
    tpu.vector_store %arg13[%c0_35, %c0_36], %39 {strides = array<i32>} : memref<2x2xf32, #tpu.memory_space<vmem>>, vector<2x2xf32>,
    return
  }
}

</mosaic_0001>

<bundles_post_ra>
// kernel: actor_forward.1
= control target key start
LH: loop header
LB: loop body
LE: loop exit
PB: predicated region body
PF: predicated region fallthrough
CT: control target
= control target key end

     0   :  { %vm66_vm0 = vcmask 1043456   ;;  %v1312_v2 = vmov 0.0   ;;  %vm62_vm1 = vcmask 293888   ;;  %vm1313_vm2 = vmmov 0   ;;  %s1908_s0 = inlined_call_operand.vmem [shape: f32[2,36,128], index: 0, kind: input, shape index: {}]   ;;  %s1909_s1 = inlined_call_operand.vmem [shape: f32[8,36], index: 1, kind: input, shape index: {}]   ;;  %s1910_s2 = inlined_call_operand.vmem [shape: f32[1,8,1], index: 2, kind: input, shape index: {}]   ;;  %s1911_s3 = inlined_call_operand.vmem [shape: f32[1024,32], index: 3, kind: input, shape index: {}]   ;;  %s1912_s4 = inlined_call_operand.vmem [shape: f32[1,32], index: 4, kind: input, shape index: {}]   ;;  %s1913_s5 = inlined_call_operand.vmem [shape: f32[32,32], index: 5, kind: input, shape index: {}]   ;;  %s1914_s6 = inlined_call_operand.vmem [shape: f32[2,32], index: 6, kind: input, shape index: {}]   ;;  %s1915_s7 = inlined_call_operand.vmem [shape: f32[2,32], index: 7, kind: input, shape index: {}]   ;;  %s1916_s8 = inlined_call_operand.vmem [shape: f32[1,32], index: 8, kind: input, shape index: {}]   ;;  %s1917_s9 = inlined_call_operand.vmem [shape: f32[32,2], index: 9, kind: input, shape index: {}]   ;;  %s1918_s10 = inlined_call_operand.vmem [shape: f32[1,2], index: 10, kind: input, shape index: {}]   ;;  %s1919_s11 = inlined_call_operand.vmem [shape: f32[2,2], index: 11, kind: input, shape index: {}]   ;;  %s1920_s12 = inlined_call_operand.vmem [shape: f32[2,2], index: 12, kind: input, shape index: {}]   ;;  %s1921_s13 = inlined_call_operand.hbm [shape: f32[2,2], index: 13, kind: output, shape index: {}]  }
   0x1   :  { %v49_v0 = vld [vmem:[%s1908_s0 + $0x20] sm:$0xf]  ;;  %v54_v1 = vld [vmem:[%s1908_s0 + $0x48] sm:$0xf]  ;;  %1223 = vmatprep.subr.mxu0 %v1312_v2  ;;  %1236 = vmatprep.subr.mxu1 %v1312_v2  ;;  %v48_v3 = vld [vmem:[%s1908_s0 + $0x18] sm:$0xff]  ;;  %v1314_v17 = vmov 0  }
   0x2   :  { %v53_v4 = vld [vmem:[%s1908_s0 + $0x40] sm:$0xff]  ;;  %1224 = vmatpush3.msk.msra.mxu0 %vm66_vm0, %v49_v0  ;;  %1237 = vmatpush3.msk.msra.mxu1 %vm66_vm0, %v54_v1  ;;  %v47_v5 = vld [vmem:[%s1908_s0 + $0x10] sm:$0xff]  ;;  %v52_v6 = vld [vmem:[%s1908_s0 + $0x38] sm:$0xff] }
   0x3   :  { %1225 = vmatprep.subr.mxu0 %v1312_v2  ;;  %1238 = vmatprep.subr.mxu1 %v1312_v2  ;;  %v46_v7 = vld [vmem:[%s1908_s0 + $0x8] sm:$0xff]  ;;  %v51_v8 = vld [vmem:[%s1908_s0 + $0x30] sm:$0xff]  ;;  %v45_v9 = vld [vmem:[%s1908_s0] sm:$0xff] }
   0x4   :  { %1226 = vmatpush3.msra.mxu0 %v48_v3  ;;  %1239 = vmatpush3.msra.mxu1 %v53_v4  ;;  %v50_v10 = vld [vmem:[%s1908_s0 + $0x28] sm:$0xff]  ;;  %v55_v11 = vld [vmem:[%s1909_s1] sm:$0xff]  ;;  %v312_v12 = vld [vmem:[%s1911_s3 + $0xf8] sm:$0xff] }
   0x5   :  { %1227 = vmatprep.subr.mxu0 %v1312_v2  ;;  %1240 = vmatprep.subr.mxu1 %v1312_v2  ;;  %v56_v13 = vld [vmem:[%s1910_s2] sm:$0xff]  ;;  %v344_v14 = vld [vmem:[%s1911_s3 + $0x1f8] sm:$0xff]  ;;  %v311_v18 = vld [vmem:[%s1911_s3 + $0xf0] sm:$0xff] }
   0x6   :  { %1228 = vmatpush3.msra.mxu0 %v47_v5  ;;  %1241 = vmatpush3.msra.mxu1 %v52_v6  ;;  %v296_v15 = vld [vmem:[%s1911_s3 + $0x78] sm:$0xff]  ;;  %v343_v19 = vld [vmem:[%s1911_s3 + $0x1f0] sm:$0xff]  ;;  %v310_v22 = vld [vmem:[%s1911_s3 + $0xe8] sm:$0xff] }
   0x7   :  { %1229 = vmatprep.subr.mxu0 %v1312_v2  ;;  %1242 = vmatprep.subr.mxu1 %v1312_v2  ;;  %v328_v16 = vld [vmem:[%s1911_s3 + $0x178] sm:$0xff]  ;;  %v295_v20 = vld [vmem:[%s1911_s3 + $0x70] sm:$0xff]  ;;  %v342_v23 = vld [vmem:[%s1911_s3 + $0x1e8] sm:$0xff] }
   0x8   :  { %1230 = vmatpush3.msra.mxu0 %v46_v7  ;;  %1243 = vmatpush3.msra.mxu1 %v51_v8  ;;  %v327_v21 = vld [vmem:[%s1911_s3 + $0x170] sm:$0xff]  ;;  %v294_v24 = vld [vmem:[%s1911_s3 + $0x68] sm:$0xff]  ;;  %v309_v26 = vld [vmem:[%s1911_s3 + $0xe0] sm:$0xff] }
   0x9   :  { %1231 = vmatprep.subr.mxu0 %v1312_v2  ;;  %1244 = vmatprep.subr.mxu1 %v1312_v2  ;;  %v326_v25 = vld [vmem:[%s1911_s3 + $0x168] sm:$0xff]  ;;  %v341_v27 = vld [vmem:[%s1911_s3 + $0x1e0] sm:$0xff] }
   0xa   :  { %1232 = vmatpush3.msra.mxu0 %v45_v9  ;;  %1233 = vmatprep.mubr.msk.f32.mxu0 %vm1313_vm2, %v1312_v2 }
   0xb   :  { %1245 = vmatpush3.msra.mxu1 %v50_v10  ;;  %1246 = vmatprep.mubr.msk.f32.mxu1 %vm1313_vm2, %v1312_v2 }
   0xc   :  { %1234 = vmatmul.mubr.msk.f32.vlgmr.msra.gmra.mxu0 %vm62_vm1, %v55_v11  ;;  %1247 = vmatmul.mubr.msk.f32.vlgmr.msra.gmra.mxu1 %vm62_vm1, %v55_v11 }
   0xd   :  { %1287 = vset.pattern.permute.xlu0 %v1314_v17  ;;  %1069 = vmatprep.subr.mxu0 %v312_v12 }
   0xe   :  { %59 = vperm.xlu0 %1287, %v56_v13   ;;  %1104 = vmatprep.subr.mxu1 %v344_v14 }
   0xf   :  { %1070 = vmatpush3.msra.mxu0 %v296_v15  ;;  %1105 = vmatpush3.msra.mxu1 %v328_v16 }
  0x10   :  { %1071 = vmatprep.subr.mxu0 %v311_v18  ;;  %1106 = vmatprep.subr.mxu1 %v343_v19 }
  0x11   :  { %1072 = vmatpush3.msra.mxu0 %v295_v20  ;;  %1107 = vmatpush3.msra.mxu1 %v327_v21 }
  0x12   :  { %18 = vsyncpa [#allocation3], 0  ;;  %1073 = vmatprep.subr.mxu0 %v310_v22  ;;  %1108 = vmatprep.subr.mxu1 %v342_v23  ;;  %v293_v28 = vld [vmem:[%s1911_s3 + $0x60] sm:$0xff]  ;;  %v308_v30 = vld [vmem:[%s1911_s3 + $0xd8] sm:$0xff]  ;;  %v1315_v17 = vmov 1983009808   ;;  %v219_v19 = vlaneseq }
  0x13   :  { %v325_v29 = vld [vmem:[%s1911_s3 + $0x160] sm:$0xff]  ;;  %1074 = vmatpush3.msra.mxu0 %v294_v24  ;;  %1109 = vmatpush3.msra.mxu1 %v326_v25  ;;  %v340_v31 = vld [vmem:[%s1911_s3 + $0x1d8] sm:$0xff]  ;;  %v307_v34 = vld [vmem:[%s1911_s3 + $0xd0] sm:$0xff]  ;;  %v217_v18 = vunpack.c.l.s4 %v1315_v17  ;;  %v1316_v20 = vmov 1934713408   ;;  %vm707_vm3 = vcmask 1041408  }
  0x14   :  { %1075 = vmatprep.subr.mxu0 %v309_v26  ;;  %1110 = vmatprep.subr.mxu1 %v341_v27  ;;  %v292_v32 = vld [vmem:[%s1911_s3 + $0x58] sm:$0xff]  ;;  %v339_v35 = vld [vmem:[%s1911_s3 + $0x1d0] sm:$0xff]  ;;  %v306_v38 = vld [vmem:[%s1911_s3 + $0xc8] sm:$0xff]  ;;  %v248_v21 = vunpack.c.l.s4 %v1316_v20  ;;  %v220_v23 = vshrl.u32 %v219_v19, 7  ;;  %vm703_vm4 = vcmask 15360   ;;  %vm781_vm5 = vcmask 261120  }
  0x15   :  { %v324_v33 = vld [vmem:[%s1911_s3 + $0x158] sm:$0xff]  ;;  %1076 = vmatpush3.msra.mxu0 %v293_v28  ;;  %1111 = vmatpush3.msra.mxu1 %v325_v29  ;;  %v291_v36 = vld [vmem:[%s1911_s3 + $0x50] sm:$0xff]  ;;  %v338_v39 = vld [vmem:[%s1911_s3 + $0x1c8] sm:$0xff]  ;;  %v218_v22 = vunpack.c.0.s8 %v217_v18  ;;  %vm1028_vm6 = vcmask 9216  }
  0x16   :  { %1077 = vmatprep.subr.mxu0 %v308_v30  ;;  %1112 = vmatprep.subr.mxu1 %v340_v31  ;;  %v323_v37 = vld [vmem:[%s1911_s3 + $0x150] sm:$0xff]  ;;  %v290_v40 = vld [vmem:[%s1911_s3 + $0x48] sm:$0xff]  ;;  %v305_v42 = vld [vmem:[%s1911_s3 + $0xc0] sm:$0xff]  ;;  %v249_v27 = vunpack.c.0.s8 %v248_v21 }
  0x17   :  { %1078 = vmatpush3.msra.mxu0 %v292_v32  ;;  %1113 = vmatpush3.msra.mxu1 %v324_v33  ;;  %v322_v41 = vld [vmem:[%s1911_s3 + $0x148] sm:$0xff]  ;;  %v337_v43 = vld [vmem:[%s1911_s3 + $0x1c0] sm:$0xff]  ;;  %v304_v46 = vld [vmem:[%s1911_s3 + $0xb8] sm:$0xff]  ;;  %v221_v29 = vsub.s32 %v218_v22, %v220_v23 }
  0x18   :  { %1079 = vmatprep.subr.mxu0 %v307_v34  ;;  %1114 = vmatprep.subr.mxu1 %v339_v35  ;;  %v289_v44 = vld [vmem:[%s1911_s3 + $0x40] sm:$0xff]  ;;  %v336_v47 = vld [vmem:[%s1911_s3 + $0x1b8] sm:$0xff]  ;;  %v303_v50 = vld [vmem:[%s1911_s3 + $0xb0] sm:$0xff]  ;;  %v252_v35 = vsub.s32 %v249_v27, %v220_v23 }
  0x19   :  { %1080 = vmatpush3.msra.mxu0 %v291_v36  ;;  %1115 = vmatpush3.msra.mxu1 %v323_v37  ;;  %v321_v45 = vld [vmem:[%s1911_s3 + $0x140] sm:$0xff]  ;;  %v288_v48 = vld [vmem:[%s1911_s3 + $0x38] sm:$0xff]  ;;  %v335_v51 = vld [vmem:[%s1911_s3 + $0x1b0] sm:$0xff] }
  0x1a   :  { %1081 = vmatprep.subr.mxu0 %v306_v38  ;;  %1116 = vmatprep.subr.mxu1 %v338_v39  ;;  %v320_v49 = vld [vmem:[%s1911_s3 + $0x138] sm:$0xff]  ;;  %v287_v52 = vld [vmem:[%s1911_s3 + $0x30] sm:$0xff]  ;;  %v302_v54 = vld [vmem:[%s1911_s3 + $0xa8] sm:$0xff] }
  0x1b   :  { %1082 = vmatpush3.msra.mxu0 %v290_v40  ;;  %1117 = vmatpush3.msra.mxu1 %v322_v41  ;;  %v319_v53 = vld [vmem:[%s1911_s3 + $0x130] sm:$0xff]  ;;  %v334_v55 = vld [vmem:[%s1911_s3 + $0x1a8] sm:$0xff]  ;;  %v301_v58 = vld [vmem:[%s1911_s3 + $0xa0] sm:$0xff] }
  0x1c   :  { %1083 = vmatprep.subr.mxu0 %v305_v42  ;;  %1118 = vmatprep.subr.mxu1 %v337_v43  ;;  %v286_v56 = vld [vmem:[%s1911_s3 + $0x28] sm:$0xff]  ;;  %v333_v59 = vld [vmem:[%s1911_s3 + $0x1a0] sm:$0xff]  ;;  %v300_v62 = vld [vmem:[%s1911_s3 + $0x98] sm:$0xff] }
  0x1d   :  { %1084 = vmatpush3.msra.mxu0 %v289_v44  ;;  %1119 = vmatpush3.msra.mxu1 %v321_v45  ;;  %v318_v57 = vld [vmem:[%s1911_s3 + $0x128] sm:$0xff]  ;;  %v285_v60 = vld [vmem:[%s1911_s3 + $0x20] sm:$0xff]  ;;  %v332_v63 = vld [vmem:[%s1911_s3 + $0x198] sm:$0xff] }
  0x1e   :  { %1085 = vmatprep.subr.mxu0 %v304_v46  ;;  %1120 = vmatprep.subr.mxu1 %v336_v47  ;;  %v317_v61 = vld [vmem:[%s1911_s3 + $0x120] sm:$0xff]  ;;  %v284_v0 = vld [vmem:[%s1911_s3 + $0x18] sm:$0xff]  ;;  %v299_v3 = vld [vmem:[%s1911_s3 + $0x90] sm:$0xff] }
  0x1f   :  { %1086 = vmatpush3.msra.mxu0 %v288_v48  ;;  %1121 = vmatpush3.msra.mxu1 %v320_v49  ;;  %v316_v1 = vld [vmem:[%s1911_s3 + $0x118] sm:$0xff]  ;;  %v331_v4 = vld [vmem:[%s1911_s3 + $0x190] sm:$0xff]  ;;  %v298_v7 = vld [vmem:[%s1911_s3 + $0x88] sm:$0xff] }
  0x20   :  { %1087 = vmatprep.subr.mxu0 %v303_v50  ;;  %1122 = vmatprep.subr.mxu1 %v335_v51  ;;  %v283_v5 = vld [vmem:[%s1911_s3 + $0x10] sm:$0xff]  ;;  %v330_v8 = vld [vmem:[%s1911_s3 + $0x188] sm:$0xff]  ;;  %v297_v11 = vld [vmem:[%s1911_s3 + $0x80] sm:$0xff] }
  0x21   :  { %1088 = vmatpush3.msra.mxu0 %v287_v52  ;;  %1123 = vmatpush3.msra.mxu1 %v319_v53  ;;  %v315_v6 = vld [vmem:[%s1911_s3 + $0x110] sm:$0xff]  ;;  %v282_v9 = vld [vmem:[%s1911_s3 + $0x8] sm:$0xff]  ;;  %v329_v12 = vld [vmem:[%s1911_s3 + $0x180] sm:$0xff] }
  0x22   :  { %1089 = vmatprep.subr.mxu0 %v302_v54  ;;  %1124 = vmatprep.subr.mxu1 %v334_v55  ;;  %v314_v10 = vld [vmem:[%s1911_s3 + $0x108] sm:$0xff]  ;;  %v281_v13 = vld [vmem:[%s1911_s3] sm:$0xff]  ;;  %v376_v15 = vld [vmem:[%s1911_s3 + $0x2f8] sm:$0xff] }
  0x23   :  { %1090 = vmatpush3.msra.mxu0 %v286_v56  ;;  %1125 = vmatpush3.msra.mxu1 %v318_v57  ;;  %v313_v14 = vld [vmem:[%s1911_s3 + $0x100] sm:$0xff]  ;;  %v408_v16 = vld [vmem:[%s1911_s3 + $0x3f8] sm:$0xff]  ;;  %v375_v54 = vld [vmem:[%s1911_s3 + $0x2f0] sm:$0xff] }
  0x24   :  { %1091 = vmatprep.subr.mxu0 %v301_v58  ;;  %1126 = vmatprep.subr.mxu1 %v333_v59  ;;  %v360_v52 = vld [vmem:[%s1911_s3 + $0x278] sm:$0xff]  ;;  %v407_v57 = vld [vmem:[%s1911_s3 + $0x3f0] sm:$0xff]  ;;  %v369_v17 = vld [vmem:[%s1911_s3 + $0x2c0] sm:$0xff] }
  0x25   :  { %1092 = vmatpush3.msra.mxu0 %v285_v60  ;;  %1127 = vmatpush3.msra.mxu1 %v317_v61  ;;  %v392_v53 = vld [vmem:[%s1911_s3 + $0x378] sm:$0xff]  ;;  %v359_v58 = vld [vmem:[%s1911_s3 + $0x270] sm:$0xff]  ;;  %v374_v60 = vld [vmem:[%s1911_s3 + $0x2e8] sm:$0xff] }
  0x26   :  { %1093 = vmatprep.subr.mxu0 %v300_v62  ;;  %1128 = vmatprep.subr.mxu1 %v332_v63  ;;  %v391_v59 = vld [vmem:[%s1911_s3 + $0x370] sm:$0xff]  ;;  %v406_v61 = vld [vmem:[%s1911_s3 + $0x3e8] sm:$0xff]  ;;  %v401_v18 = vld [vmem:[%s1911_s3 + $0x3c0] sm:$0xff] }
  0x27   :  { %1094 = vmatpush3.msra.mxu0 %v284_v0  ;;  %1129 = vmatpush3.msra.mxu1 %v316_v1  ;;  %v358_v62 = vld [vmem:[%s1911_s3 + $0x268] sm:$0xff]  ;;  %v373_v0 = vld [vmem:[%s1911_s3 + $0x2e0] sm:$0xff]  ;;  %v368_v21 = vld [vmem:[%s1911_s3 + $0x2b8] sm:$0xff] }
  0x28   :  { %1095 = vmatprep.subr.mxu0 %v299_v3  ;;  %1130 = vmatprep.subr.mxu1 %v331_v4  ;;  %v390_v63 = vld [vmem:[%s1911_s3 + $0x368] sm:$0xff]  ;;  %v405_v1 = vld [vmem:[%s1911_s3 + $0x3e0] sm:$0xff]  ;;  %v400_v22 = vld [vmem:[%s1911_s3 + $0x3b8] sm:$0xff] }
  0x29   :  { %1096 = vmatpush3.msra.mxu0 %v283_v5  ;;  %1131 = vmatpush3.msra.mxu1 %v315_v6  ;;  %v357_v3 = vld [vmem:[%s1911_s3 + $0x260] sm:$0xff]  ;;  %v372_v5 = vld [vmem:[%s1911_s3 + $0x2d8] sm:$0xff]  ;;  %v351_v27 = vld [vmem:[%s1911_s3 + $0x230] sm:$0xff] }
  0x2a   :  { %1097 = vmatprep.subr.mxu0 %v298_v7  ;;  %1132 = vmatprep.subr.mxu1 %v330_v8  ;;  %v389_v4 = vld [vmem:[%s1911_s3 + $0x360] sm:$0xff]  ;;  %v404_v6 = vld [vmem:[%s1911_s3 + $0x3d8] sm:$0xff] }
  0x2b   :  { %1098 = vmatpush3.msra.mxu0 %v282_v9  ;;  %1133 = vmatpush3.msra.mxu1 %v314_v10  ;;  %v356_v7 = vld [vmem:[%s1911_s3 + $0x258] sm:$0xff]  ;;  %v371_v9 = vld [vmem:[%s1911_s3 + $0x2d0] sm:$0xff]  ;;  %v353_v19 = vld [vmem:[%s1911_s3 + $0x240] sm:$0xff] }
  0x2c   :  { %1099 = vmatprep.subr.mxu0 %v297_v11  ;;  %1134 = vmatprep.subr.mxu1 %v329_v12  ;;  %v388_v8 = vld [vmem:[%s1911_s3 + $0x358] sm:$0xff]  ;;  %v403_v10 = vld [vmem:[%s1911_s3 + $0x3d0] sm:$0xff]  ;;  %v385_v20 = vld [vmem:[%s1911_s3 + $0x340] sm:$0xff] }
  0x2d   :  { %1100 = vmatpush3.msra.mxu0 %v281_v13  ;;  %1135 = vmatpush3.msra.mxu1 %v313_v14  ;;  %v355_v11 = vld [vmem:[%s1911_s3 + $0x250] sm:$0xff]  ;;  %v370_v13 = vld [vmem:[%s1911_s3 + $0x2c8] sm:$0xff]  ;;  %v352_v23 = vld [vmem:[%s1911_s3 + $0x238] sm:$0xff] }
  0x2e   :  { %1139 = vmatprep.subr.mxu0 %v376_v15  ;;  %1174 = vmatprep.subr.mxu1 %v408_v16  ;;  %v387_v12 = vld [vmem:[%s1911_s3 + $0x350] sm:$0xff]  ;;  %v402_v14 = vld [vmem:[%s1911_s3 + $0x3c8] sm:$0xff] }
  0x2f   :  { %v354_v15 = vld [vmem:[%s1911_s3 + $0x248] sm:$0xff] }
  0x30   :  { %v386_v16 = vld [vmem:[%s1911_s3 + $0x348] sm:$0xff] }
  0x89   :  { %v60_v24 = vpop.permute.xlu0 %59 }
  0xcc   :  { %v136_v25 = vpop.f32.mrf.mxu0  ;;  %v209_v26 = vpop.f32.mrf.mxu1 }
  0xcd   :  { %v137_v28 = vadd.f32 %v136_v25, %v60_v24  ;;  %v210_v30 = vadd.f32 %v209_v26, %v60_v24  ;;  %v384_v24 = vld [vmem:[%s1911_s3 + $0x338] sm:$0xff]  ;;  %v367_v25 = vld [vmem:[%s1911_s3 + $0x2b0] sm:$0xff] }
  0xce   :  { %v1235_v31 = vpop.f32.mrf.mxu0  ;;  %v1248_v32 = vpop.f32.mrf.mxu1  ;;  %v399_v26 = vld [vmem:[%s1911_s3 + $0x3b0] sm:$0xff] }
  0xcf   :  { %v213_v33 = vmax.f32 %v137_v28, 0.0  ;;  %v214_v34 = vmax.f32 %v210_v30, 0.0  ;;  %v383_v28 = vld [vmem:[%s1911_s3 + $0x330] sm:$0xff]  ;;  %v398_v30 = vld [vmem:[%s1911_s3 + $0x3a8] sm:$0xff] }
  0xd0   :  { %v350_v31 = vld [vmem:[%s1911_s3 + $0x228] sm:$0xff] }
  0xd1   :  { %v215_v36 = vcombine.high %v213_v33, %v1312_v2  ;;  %v222_v37 = vrot.slane %v213_v33, %v221_v29  ;;  %v230_v38 = vcombine.high %v214_v34, %v1312_v2  ;;  %v237_v39 = vrot.slane %v214_v34, %v221_v29  ;;  %v382_v32 = vld [vmem:[%s1911_s3 + $0x328] sm:$0xff]  ;;  %v365_v33 = vld [vmem:[%s1911_s3 + $0x2a0] sm:$0xff] }
  0xd2   :  { %v397_v34 = vld [vmem:[%s1911_s3 + $0x3a0] sm:$0xff] }
  0xd3   :  { %v229_v40 = vrot.slane %v215_v36, %v221_v29  ;;  %v244_v41 = vrot.slane %v230_v38, %v221_v29  ;;  %v245_v42 = vcombine.low %v222_v37, %v237_v39  ;;  %v246_v43 = vcombine.high %v222_v37, %v237_v39  ;;  %v366_v29 = vld [vmem:[%s1911_s3 + $0x2a8] sm:$0xff]  ;;  %v381_v36 = vld [vmem:[%s1911_s3 + $0x320] sm:$0xff]  ;;  %v364_v37 = vld [vmem:[%s1911_s3 + $0x298] sm:$0xff] }
  0xd4   :  { %v396_v38 = vld [vmem:[%s1911_s3 + $0x398] sm:$0xff] }
  0xd5   :  { %v261_v44 = vcombine.low %v229_v40, %v244_v41  ;;  %v262_v45 = vcombine.high %v229_v40, %v244_v41  ;;  %v253_v46 = vrot.slane %v245_v42, %v252_v35  ;;  %v260_v47 = vrot.slane %v246_v43, %v252_v35  ;;  %v348_v39 = vld [vmem:[%s1911_s3 + $0x218] sm:$0xff]  ;;  %v363_v41 = vld [vmem:[%s1911_s3 + $0x290] sm:$0xff] }
  0xd6   :  { %v380_v40 = vld [vmem:[%s1911_s3 + $0x318] sm:$0xff]  ;;  %v395_v42 = vld [vmem:[%s1911_s3 + $0x390] sm:$0xff] }
  0xd7   :  { %v277_v48 = vcombine.high %v253_v46, %v1312_v2  ;;  %v278_v49 = vcombine.high %v260_v47, %v1312_v2  ;;  %v1640_v50 = vrot.slane %v261_v44, %v252_v35  ;;  %v1642_v51 = vrot.slane %v262_v45, %v252_v35  ;;  %v349_v35 = vld [vmem:[%s1911_s3 + $0x220] sm:$0xff]  ;;  %v347_v43 = vld [vmem:[%s1911_s3 + $0x210] sm:$0xff]  ;;  %v362_v45 = vld [vmem:[%s1911_s3 + $0x288] sm:$0xff] }
  0xd8   :  { %v379_v44 = vld [vmem:[%s1911_s3 + $0x310] sm:$0xff] }
  0xd9   :  { %480 = vmatprep.mubr.f32.mxu0 %v277_v48  ;;  %550 = vmatprep.mubr.f32.mxu1 %v278_v49  ;;  %v279_v55 = vcombine.high %v1640_v50, %v1312_v2  ;;  %v280_v56 = vcombine.high %v1642_v51, %v1312_v2  ;;  %v378_v48 = vld [vmem:[%s1911_s3 + $0x308] sm:$0xff]  ;;  %v361_v49 = vld [vmem:[%s1911_s3 + $0x280] sm:$0xff] }
  0xda   :  { %481 = vmatmul.mubr.f32.vlgmr.msra.gmra.mxu0 %v253_v46  ;;  %551 = vmatmul.mubr.f32.vlgmr.msra.gmra.mxu1 %v260_v47  ;;  %v394_v46 = vld [vmem:[%s1911_s3 + $0x388] sm:$0xff] }
  0xdb   :  { %1140 = vmatpush3.msra.mxu0 %v360_v52  ;;  %1175 = vmatpush3.msra.mxu1 %v392_v53  ;;  %v346_v47 = vld [vmem:[%s1911_s3 + $0x208] sm:$0xff]  ;;  %v393_v52 = vld [vmem:[%s1911_s3 + $0x380] sm:$0xff] }
  0xdc   :  { %1141 = vmatprep.subr.mxu0 %v375_v54  ;;  %620 = vmatprep.mubr.f32.mxu0 %v279_v55  ;;  %v345_v53 = vld [vmem:[%s1911_s3 + $0x200] sm:$0xff] }
  0xdd   :  { %1176 = vmatprep.subr.mxu1 %v407_v57  ;;  %690 = vmatprep.mubr.f32.mxu1 %v280_v56  ;;  %v377_v54 = vld [vmem:[%s1911_s3 + $0x300] sm:$0xff]  ;;  %v699_v56 = vld [vmem:[%s1913_s5 + $0x10] sm:$0xff]  ;;  %v698_v57 = vld [vmem:[%s1913_s5 + $0x8] sm:$0xff] }
  0xde   :  { %1142 = vmatpush3.msra.mxu0 %v359_v58  ;;  %1177 = vmatpush3.msra.mxu1 %v391_v59  ;;  %v702_v55 = vld [vmem:[%s1914_s6] sm:$0x3] }
  0xdf   :  { %1143 = vmatprep.subr.mxu0 %v374_v60  ;;  %1178 = vmatprep.subr.mxu1 %v406_v61  ;;  %v856_v58 = vld [vmem:[%s1915_s7] sm:$0x3] }
  0xe0   :  { %1144 = vmatpush3.msra.mxu0 %v358_v62  ;;  %1179 = vmatpush3.msra.mxu1 %v390_v63  ;;  %v697_v59 = vld [vmem:[%s1913_s5] sm:$0xff] }
  0xe1   :  { %1145 = vmatprep.subr.mxu0 %v373_v0  ;;  %1180 = vmatprep.subr.mxu1 %v405_v1  ;;  %v855_v60 = vld [vmem:[%s1920_s12] sm:$0x3] }
  0xe2   :  { %1146 = vmatpush3.msra.mxu0 %v357_v3  ;;  %1181 = vmatpush3.msra.mxu1 %v389_v4  ;;  %v1048_v1 = vld [vmem:[%s1912_s4] ss:$0 sm:$0xff] }
  0xe3   :  { %1147 = vmatprep.subr.mxu0 %v372_v5  ;;  %1182 = vmatprep.subr.mxu1 %v404_v6 }
  0xe4   :  { %1148 = vmatpush3.msra.mxu0 %v356_v7  ;;  %1183 = vmatpush3.msra.mxu1 %v388_v8 }
  0xe5   :  { %1149 = vmatprep.subr.mxu0 %v371_v9  ;;  %1184 = vmatprep.subr.mxu1 %v403_v10 }
  0xe6   :  { %1150 = vmatpush3.msra.mxu0 %v355_v11  ;;  %1185 = vmatpush3.msra.mxu1 %v387_v12 }
  0xe7   :  { %1151 = vmatprep.subr.mxu0 %v370_v13  ;;  %1186 = vmatprep.subr.mxu1 %v402_v14 }
  0xe8   :  { %1152 = vmatpush3.msra.mxu0 %v354_v15  ;;  %1187 = vmatpush3.msra.mxu1 %v386_v16 }
  0xe9   :  { %1153 = vmatprep.subr.mxu0 %v369_v17  ;;  %1188 = vmatprep.subr.mxu1 %v401_v18 }
  0xea   :  { %1154 = vmatpush3.msra.mxu0 %v353_v19  ;;  %1189 = vmatpush3.msra.mxu1 %v385_v20  ;;  %v946_v19 = vld [vmem:[%s1917_s9 + $0x18] sm:$0xff] }
  0xeb   :  { %1155 = vmatprep.subr.mxu0 %v368_v21  ;;  %1190 = vmatprep.subr.mxu1 %v400_v22  ;;  %v945_v21 = vld [vmem:[%s1917_s9 + $0x10] sm:$0xff]  ;;  %v944_v22 = vld [vmem:[%s1917_s9 + $0x8] sm:$0xff] }
  0xec   :  { %1156 = vmatpush3.msra.mxu0 %v352_v23  ;;  %1191 = vmatpush3.msra.mxu1 %v384_v24  ;;  %v943_v23 = vld [vmem:[%s1917_s9] sm:$0xff]  ;;  %s1317_s9 = smov [#allocation2]  }
  0xed   :  { %1157 = vmatprep.subr.mxu0 %v367_v25  ;;  %1192 = vmatprep.subr.mxu1 %v399_v26  ;;  %v1054_v26 = vld [vmem:[%s1916_s8] ss:$0 sm:$0xff]  ;;  %s1036_s30 = sshll.u32 %s1317_s9, 4  ;;  %s1037_s30 = int_to_ptr.vmem [resolvable:$true] %s1036_s30 }
  0xee   :  { %1158 = vmatpush3.msra.mxu0 %v351_v27  ;;  %1193 = vmatpush3.msra.mxu1 %v383_v28  ;;  %s1290_s8 = scalar_lea.vmem %s1037_s30, 32  ;;  %p1295_p1 = scmp.lt.s32.totalorder %s1037_s30, %s1037_s30 }
  0xef   :  { %1159 = vmatprep.subr.mxu0 %v366_v29  ;;  %1194 = vmatprep.subr.mxu1 %v398_v30  ;;  %p1291_p0 = scmp.ne.s32.totalorder %s1037_s30, %s1290_s8  ;;  %p1296_p2 = scmp.lt.s32.totalorder %s1290_s8, %s1290_s8 }
  0xf0   :  { %1160 = vmatpush3.msra.mxu0 %v350_v31  ;;  %1195 = vmatpush3.msra.mxu1 %v382_v32 }
  0xf1   :  { %1161 = vmatprep.subr.mxu0 %v365_v33  ;;  %1196 = vmatprep.subr.mxu1 %v397_v34  ;;  %p1297_p3 = por %p1296_p2, %p1295_p1 }
  0xf2   :  { %1162 = vmatpush3.msra.mxu0 %v349_v35  ;;  %1197 = vmatpush3.msra.mxu1 %v381_v36 }
  0xf3   :  { %1163 = vmatprep.subr.mxu0 %v364_v37  ;;  %1198 = vmatprep.subr.mxu1 %v396_v38  ;;  %p1298_p4 = pnand %p1297_p3, %p1291_p0 }
  0xf4   :  { %1164 = vmatpush3.msra.mxu0 %v348_v39  ;;  %1199 = vmatpush3.msra.mxu1 %v380_v40 }
  0xf5   :  { %1165 = vmatprep.subr.mxu0 %v363_v41  ;;  %1200 = vmatprep.subr.mxu1 %v395_v42 }
  0xf6   :  { %1166 = vmatpush3.msra.mxu0 %v347_v43  ;;  %1201 = vmatpush3.msra.mxu1 %v379_v44 }
  0xf7   :  { %1167 = vmatprep.subr.mxu0 %v362_v45  ;;  %1202 = vmatprep.subr.mxu1 %v394_v46 }
  0xf8   :  { %1168 = vmatpush3.msra.mxu0 %v346_v47  ;;  %1203 = vmatpush3.msra.mxu1 %v378_v48 }
  0xf9   :  { %1169 = vmatprep.subr.mxu0 %v361_v49  ;;  %1204 = vmatprep.subr.mxu1 %v393_v52 }
  0xfa   :  { %1170 = vmatpush3.msra.mxu0 %v345_v53  ;;  %1205 = vmatpush3.msra.mxu1 %v377_v54 }
  0xfb   :  { %621 = vmatmul.mubr.f32.vlgmr.msra.gmra.mxu0 %v1640_v50  ;;  %691 = vmatmul.mubr.f32.vlgmr.msra.gmra.mxu1 %v1642_v51  ;;  %v701_v50 = vld [vmem:[%s1919_s11] sm:$0x3]  ;;  %v700_v51 = vld [vmem:[%s1913_s5 + $0x18] sm:$0xff] }
  0xfc   :  { %1249 = vmatprep.subr.mxu1 %v1312_v2  ;;  %1251 = vmatprep.mubr.msk.f32.mxu1 %vm1313_vm2, %v1312_v2 }
  0xfd   :  { %1265 = vmatprep.subr.mxu0 %v1312_v2  ;;  %1267 = vmatprep.mubr.msk.f32.mxu0 %vm1313_vm2, %v1312_v2 }
  0xfe   :  { %1250 = vmatpush3.msk.msra.mxu1 %vm707_vm3, %v702_v55  ;;  %1266 = vmatpush3.msk.msra.mxu0 %vm707_vm3, %v856_v58 }
  0xff   :  { %1252 = vmatmul.mubr.msk.f32.vlgmr.msra.gmra.mxu1 %vm703_vm4, %v701_v50  ;;  %1254 = vmatprep.subr.mxu1 %v1312_v2 }
 0x100   :  { %1262 = vmatprep.mubr.msk.f32.mxu1 %vm1313_vm2, %v1312_v2  ;;  %1255 = vmatpush3.msra.mxu1 %v700_v51 }
 0x101   :  { %1256 = vmatprep.subr.mxu1 %v1312_v2  ;;  %1268 = vmatmul.mubr.msk.f32.vlgmr.msra.gmra.mxu0 %vm703_vm4, %v855_v60 }
 0x102   :  { %1257 = vmatpush3.msra.mxu1 %v699_v56  ;;  %1270 = vmatprep.subr.mxu0 %v1312_v2 }
 0x103   :  { %1258 = vmatprep.subr.mxu1 %v1312_v2  ;;  %1278 = vmatprep.mubr.msk.f32.mxu0 %vm1313_vm2, %v1312_v2 }
 0x104   :  { %1259 = vmatpush3.msra.mxu1 %v698_v57  ;;  %1271 = vmatpush3.msra.mxu0 %v946_v19 }
 0x105   :  { %1260 = vmatprep.subr.mxu1 %v1312_v2  ;;  %1272 = vmatprep.subr.mxu0 %v1312_v2 }
 0x106   :  { %1261 = vmatpush3.msra.mxu1 %v697_v59  ;;  %1273 = vmatpush3.msra.mxu0 %v945_v21 }
 0x107   :  { %1274 = vmatprep.subr.mxu0 %v1312_v2 }
 0x108   :  { %1275 = vmatpush3.msra.mxu0 %v944_v22 }
 0x109   :  { %1276 = vmatprep.subr.mxu0 %v1312_v2  ;;  %v1055_v2 = vld [vmem:[%s1918_s10] ss:$0 sm:$0xff] }
 0x10a   :  { %1277 = vmatpush3.msra.mxu0 %v943_v23 }
 0x19a   :  { %v1101_v61 = vpop.f32.mrf.mxu0  ;;  %v1136_v63 = vpop.f32.mrf.mxu1 }
 0x19c   :  { %v1102_v62 = vpop.f32.mrf.mxu0  ;;  %v1137_v3 = vpop.f32.mrf.mxu1 }
 0x19d   :  { %v1103_v0 = vadd.f32 %v1102_v62, %v1101_v61  ;;  %v1138_v7 = vadd.f32 %v1137_v3, %v1136_v63 }
 0x19f   :  { %v483_v4 = vadd.f32 %v1103_v0, %v1048_v1 }
 0x1a1   :  { %v553_v10 = vadd.f32 %v1138_v7, %v483_v4 }
 0x1bb   :  { %v1171_v5 = vpop.f32.mrf.mxu0  ;;  %v1206_v6 = vpop.f32.mrf.mxu1 }
 0x1bd   :  { %v1172_v8 = vpop.f32.mrf.mxu0  ;;  %v1207_v9 = vpop.f32.mrf.mxu1 }
 0x1be   :  { %v1173_v11 = vadd.f32 %v1172_v8, %v1171_v5  ;;  %v1208_v13 = vadd.f32 %v1207_v9, %v1206_v6 }
 0x1bf   :  { %v777_v16 = vpop.f32.mrf.mxu1 }
 0x1c0   :  { %v623_v12 = vadd.f32 %v1173_v11, %v553_v10 }
 0x1c1   :  { %v1253_v17 = vpop.f32.mrf.mxu1  ;;  %v929_v18 = vpop.f32.mrf.mxu0 }
 0x1c2   :  { %v693_v14 = vadd.f32 %v1208_v13, %v623_v12 }
 0x1c3   :  { %v1269_v20 = vpop.f32.mrf.mxu0 }
 0x1c4   :  { %v696_v15 = vmax.f32 %v693_v14, 0.0 }
 0x1c6   :  { %1263 = vmatmul.mubr.msk.f32.vlgmr.msra.gmra.mxu1 %vm781_vm5, %v696_v15 }
 0x286   :  { %v851_v24 = vpop.f32.mrf.mxu1 }
 0x287   :  { %v852_v25 = vadd.f32 %v851_v24, %v777_v16 }
 0x288   :  { %v1264_v27 = vpop.f32.mrf.mxu1 }
 0x289   :  { %v933_v28 = vadd.f32 %v929_v18, %v852_v25 }
 0x28b   :  { %v941_v29 = vadd.f32 %v1054_v26, %v933_v28 }
 0x28d   :  { %v942_v30 = vmax.f32 %v941_v29, 0.0 }
 0x28f   :  { %1279 = vmatmul.mubr.msk.f32.vlgmr.msra.gmra.mxu0 %vm781_vm5, %v942_v30 }
 0x34f   :  { %v1023_v31 = vpop.f32.mrf.mxu0 }
 0x350   :  { %v1024_v32 = vadd.f32 %v1055_v2, %v1023_v31 }
 0x351   :  { %v1280_v33 = vpop.f32.mrf.mxu0 }
 0x352   :  { %1288 = vtanh.f32 %v1024_v32 }
 0x35f   :  { %v1289_v34 = vpop.eup %1288 }
 0x360   :  { %1029 = vst.msk [vmem:[#allocation2] sm:$0x3] %vm1028_vm6, %v1289_v34 }
 0x361   :  { %1301 = shalt.err (!%p1298_p4)
}
 0x362   :  { %1039 = dma.vmem_to_hbm [thread:$0]  %s1037_s30, 32, %s1921_s13, [#allocation3]  }
 0x363   :  { %1310 = dma.done.wait [#allocation3], 32  }
 0x364   :  { %1311 = vsyncadd [#allocation3], 4294967264 }
 0x365   :  { %1043 = vsyncpa [#allocation3], 1 }

</bundles_post_ra>
